<compile_context>
chip_gen: v6e
topology: v6e:2x2x1
jax: 0.10.0
libtpu: 0.0.40
codegen_flags: <defaults>
</compile_context>

<pallas_src>
import functools
import math

import jax
import jax.numpy as jnp
from jax import lax
from jax.experimental import pallas as pl
from jax.experimental.pallas import tpu as pltpu


def _layernorm(x, w, b, eps=1e-5):
    # PyTorch LayerNorm: biased variance, eps inside sqrt.
    m = jnp.mean(x, axis=-1, keepdims=True)
    v = jnp.mean((x - m) ** 2, axis=-1, keepdims=True)
    return (x - m) * lax.rsqrt(v + eps) * w + b


def encoder_kernel(x_rows_ref, x_full_ref,
                   wq_ref, bq_ref, wkv_ref, bkv_ref, wo_ref, bo_ref,
                   ln1w_ref, ln1b_ref,
                   w1_ref, b1_ref, w2_ref, b2_ref,
                   ln2w_ref, ln2b_ref,
                   o_ref, *, num_heads, compute_dtype):
    f32 = jnp.float32
    cdt = compute_dtype

    x_rows = x_rows_ref[0].astype(f32)          # (tS, E)  residual path in f32
    tS, E = x_rows.shape
    dh = E // num_heads
    scale = 1.0 / math.sqrt(dh)

    xr_c = x_rows.astype(cdt)                   # (tS, E) matmul operand (bf16)
    xf_c = x_full_ref[0].astype(cdt)            # (S, E)  full sequence for K/V

    # ---- In-projection: Q for this tile's rows, fused K/V for full sequence ----
    q = jnp.dot(xr_c, wq_ref[...],
                preferred_element_type=f32) + bq_ref[...]               # (tS, E)
    kv = jnp.dot(xf_c, wkv_ref[...],
                 preferred_element_type=f32) + bkv_ref[...]             # (S, 2E)

    # nn.MultiheadAttention scales q (incl. bias) by 1/sqrt(head_dim).
    q_c = (q * scale).astype(cdt)               # (tS, E) bf16
    k_c = kv[:, :E].astype(cdt)                 # (S, E)
    v_c = kv[:, E:].astype(cdt)                 # (S, E)

    wo = wo_ref[...]                            # (E, E) bf16, loaded once

    # ---- Multi-head attention with per-head O-projection accumulation ----
    attn = jnp.zeros((tS, E), f32)
    for h in range(num_heads):                  # static unroll over heads
        sl = slice(h * dh, (h + 1) * dh)
        qh = q_c[:, sl]                         # (tS, dh)
        kh = k_c[:, sl]                         # (S, dh)
        vh = v_c[:, sl]                         # (S, dh)

        s = jnp.einsum('qd,kd->qk', qh, kh,
                       preferred_element_type=f32)                      # (tS, S)
        s = s - jnp.max(s, axis=-1, keepdims=True)
        p = jnp.exp(s)
        p = p * pl.reciprocal(jnp.sum(p, axis=-1, keepdims=True), approx=True)

        ctx = jnp.dot(p.astype(cdt), vh, preferred_element_type=f32)    # (tS, dh)
        attn = attn + jnp.dot(ctx.astype(cdt), wo[sl, :],
                              preferred_element_type=f32)               # (tS, E)
    attn = attn + bo_ref[...]

    # ---- residual + LayerNorm1 (dropout = identity) ----
    y = x_rows + attn
    y = _layernorm(y, ln1w_ref[...], ln1b_ref[...])

    # ---- FeedForward: fc1 -> exact GELU -> fc2 -> residual -> LayerNorm2 ----
    h1 = jnp.dot(y.astype(cdt), w1_ref[...],
                 preferred_element_type=f32) + b1_ref[...]
    h1 = 0.5 * h1 * (1.0 + lax.erf(h1 * (1.0 / math.sqrt(2.0))))
    h2 = jnp.dot(h1.astype(cdt), w2_ref[...],
                 preferred_element_type=f32) + b2_ref[...]
    y = _layernorm(y + h2, ln2w_ref[...], ln2b_ref[...])

    o_ref[0] = y.astype(o_ref.dtype)


def transformer_encoder_layer(x, params, num_heads, *, seq_tile=None):
    B, S, E = x.shape

    if seq_tile is None:                        # big tiles amortize per-step cost
        seq_tile = S
        for cand in (512, 256, 128):
            if S % cand == 0:
                seq_tile = cand
                break
    assert S % seq_tile == 0, "sequence length must be divisible by seq_tile"
    tS = seq_tile
    n_s = S // tS

    kernel = functools.partial(encoder_kernel, num_heads=num_heads,
                               compute_dtype=jnp.bfloat16)

    def wspec(p):
        # Full-array block, constant index_map -> fetched once, never re-DMA'd.
        return pl.BlockSpec(p.shape, lambda b, s: (0, 0))

    in_specs = [
        pl.BlockSpec((1, tS, E), lambda b, s: (b, s, 0)),   # rows processed here
        pl.BlockSpec((1, S, E), lambda b, s: (b, 0, 0)),    # full sequence for K/V
    ] + [wspec(p) for p in params]

    fn = pl.pallas_call(
        kernel,
        out_shape=jax.ShapeDtypeStruct((B, S, E), x.dtype),
        grid=(B, n_s),
        in_specs=in_specs,
        out_specs=pl.BlockSpec((1, tS, E), lambda b, s: (b, s, 0)),
        compiler_params=pltpu.CompilerParams(
            dimension_semantics=("parallel", "parallel"),
            vmem_limit_bytes=64 * 1024 * 1024),
    )
    return fn(x, x, *params)


def init_params(key, embed_dim, hidden_dim, w_dtype=jnp.bfloat16):
    E, H = embed_dim, hidden_dim
    ks = jax.random.split(key, 8)
    sc = 0.02

    def rnd(k, shape, dtype):
        return (sc * jax.random.normal(k, shape, jnp.float32)).astype(dtype)

    # All linear weights pre-transposed: kernel computes x @ W.
    wq   = rnd(ks[0], (E, E), w_dtype)
    bq   = rnd(ks[1], (1, E), jnp.float32)
    wkv  = rnd(ks[2], (E, 2 * E), w_dtype)
    bkv  = rnd(ks[3], (1, 2 * E), jnp.float32)
    wo   = rnd(ks[4], (E, E), w_dtype)
    bo   = rnd(ks[5], (1, E), jnp.float32) * 0.5
    ln1w = jnp.ones((1, E), jnp.float32)
    ln1b = jnp.zeros((1, E), jnp.float32)
    w1   = rnd(ks[6], (E, H), w_dtype)
    b1   = rnd(ks[7], (1, H), jnp.float32)
    w2   = rnd(ks[5], (H, E), w_dtype)
    b2   = rnd(ks[6], (1, E), jnp.float32) * 0.5
    ln2w = jnp.ones((1, E), jnp.float32)
    ln2b = jnp.zeros((1, E), jnp.float32)
    return [wq, bq, wkv, bkv, wo, bo, ln1w, ln1b,
            w1, b1, w2, b2, ln2w, ln2b]


def reference(x, params, num_heads):
    (wq, bq, wkv, bkv, wo, bo, ln1w, ln1b,
     w1, b1, w2, b2, ln2w, ln2b) = [p.astype(jnp.float32) for p in params]
    B, S, E = x.shape
    dh = E // num_heads

    q = x @ wq + bq
    kv = x @ wkv + bkv
    k, v = kv[..., :E], kv[..., E:]

    def heads(t):
        return t.reshape(B, S, num_heads, dh).transpose(0, 2, 1, 3)

    q, k, v = heads(q) / math.sqrt(dh), heads(k), heads(v)
    s = jnp.einsum('bhqd,bhkd->bhqk', q, k)
    p = jax.nn.softmax(s, axis=-1)
    o = jnp.einsum('bhqk,bhkd->bhqd', p, v).transpose(0, 2, 1, 3).reshape(B, S, E)
    o = o @ wo + bo

    y = _layernorm(x + o, ln1w, ln1b)
    h1 = y @ w1 + b1
    h1 = 0.5 * h1 * (1.0 + lax.erf(h1 / math.sqrt(2.0)))
    h2 = h1 @ w2 + b2
    return _layernorm(y + h2, ln2w, ln2b)


if __name__ == "__main__":
    B, S, E, NUM_HEADS, HIDDEN = 2, 8, 32, 4, 64
    key = jax.random.PRNGKey(0)
    kx, kp = jax.random.split(key)
    x = jax.random.normal(kx, (B, S, E), jnp.float32)
    params = init_params(kp, E, HIDDEN)

    out = transformer_encoder_layer(x, params, num_heads=NUM_HEADS)
    out = jax.block_until_ready(out)

    ref = reference(x, params, num_heads=NUM_HEADS)
    assert out.shape == (B, S, E)
    # bf16 matmul operands in the kernel -> loosen tolerance vs. the f32 reference.
    assert jnp.allclose(out, ref, atol=2e-2, rtol=2e-2), (
        "mismatch vs reference: max abs err = "
        f"{float(jnp.max(jnp.abs(out - ref)))}")
    print("KERNEL_OK")
</pallas_src>

<mosaic_0001>
module attributes {stable_mosaic.version = 11 : i64} {
  func.func @encoder_kernel(%arg0: i32, %arg1: i32, %arg2: memref<1x8x32xf32, #tpu.memory_space<vmem>>, %arg3: memref<1x8x32xf32, #tpu.memory_space<vmem>>, %arg4: memref<32x32xbf16, #tpu.memory_space<vmem>>, %arg5: memref<1x32xf32, #tpu.memory_space<vmem>>, %arg6: memref<32x64xbf16, #tpu.memory_space<vmem>>, %arg7: memref<1x64xf32, #tpu.memory_space<vmem>>, %arg8: memref<32x32xbf16, #tpu.memory_space<vmem>>, %arg9: memref<1x32xf32, #tpu.memory_space<vmem>>, %arg10: memref<1x32xf32, #tpu.memory_space<vmem>>, %arg11: memref<1x32xf32, #tpu.memory_space<vmem>>, %arg12: memref<32x64xbf16, #tpu.memory_space<vmem>>, %arg13: memref<1x64xf32, #tpu.memory_space<vmem>>, %arg14: memref<64x32xbf16, #tpu.memory_space<vmem>>, %arg15: memref<1x32xf32, #tpu.memory_space<vmem>>, %arg16: memref<1x32xf32, #tpu.memory_space<vmem>>, %arg17: memref<1x32xf32, #tpu.memory_space<vmem>>, %arg18: memref<1x8x32xf32, #tpu.memory_space<vmem>>) attributes {dimension_semantics = [#tpu.dimension_semantics<parallel>, #tpu.dimension_semantics<parallel>], iteration_bounds = array<i64: 2, 1>, scalar_prefetch = 0 : i64, scratch_operands = 0 : i64, tpu.core_type = #tpu.core_type<tc>, window_params = [{transform_indices = @transform_0, window_bounds = array<i64: 1, 8, 32>}, {transform_indices = @transform_1, window_bounds = array<i64: 1, 8, 32>}, {pipeline_mode = #tpu.pipeline_mode<synchronous>, transform_indices = @transform_2, window_bounds = array<i64: 32, 32>}, {pipeline_mode = #tpu.pipeline_mode<synchronous>, transform_indices = @transform_3, window_bounds = array<i64: 1, 32>}, {pipeline_mode = #tpu.pipeline_mode<synchronous>, transform_indices = @transform_4, window_bounds = array<i64: 32, 64>}, {pipeline_mode = #tpu.pipeline_mode<synchronous>, transform_indices = @transform_5, window_bounds = array<i64: 1, 64>}, {pipeline_mode = #tpu.pipeline_mode<synchronous>, transform_indices = @transform_6, window_bounds = array<i64: 32, 32>}, {pipeline_mode = #tpu.pipeline_mode<synchronous>, transform_indices = @transform_7, window_bounds = array<i64: 1, 32>}, {pipeline_mode = #tpu.pipeline_mode<synchronous>, transform_indices = @transform_8, window_bounds = array<i64: 1, 32>}, {pipeline_mode = #tpu.pipeline_mode<synchronous>, transform_indices = @transform_9, window_bounds = array<i64: 1, 32>}, {pipeline_mode = #tpu.pipeline_mode<synchronous>, transform_indices = @transform_10, window_bounds = array<i64: 32, 64>}, {pipeline_mode = #tpu.pipeline_mode<synchronous>, transform_indices = @transform_11, window_bounds = array<i64: 1, 64>}, {pipeline_mode = #tpu.pipeline_mode<synchronous>, transform_indices = @transform_12, window_bounds = array<i64: 64, 32>}, {pipeline_mode = #tpu.pipeline_mode<synchronous>, transform_indices = @transform_13, window_bounds = array<i64: 1, 32>}, {pipeline_mode = #tpu.pipeline_mode<synchronous>, transform_indices = @transform_14, window_bounds = array<i64: 1, 32>}, {pipeline_mode = #tpu.pipeline_mode<synchronous>, transform_indices = @transform_15, window_bounds = array<i64: 1, 32>}, {transform_indices = @transform_16, window_bounds = array<i64: 1, 8, 32>}]} {
    %c0 = arith.constant 0 : index
    %c0_0 = arith.constant 0 : index
    %c0_1 = arith.constant 0 : index
    %0 = vector.load %arg2[%c0, %c0_0, %c0_1] : memref<1x8x32xf32, #tpu.memory_space<vmem>>, vector<1x8x32xf32>
    %1 = vector.shape_cast %0 : vector<1x8x32xf32> to vector<8x32xf32>
    %2 = arith.truncf %1 : vector<8x32xf32> to vector<8x32xbf16>
    %c0_2 = arith.constant 0 : index
    %c0_3 = arith.constant 0 : index
    %c0_4 = arith.constant 0 : index
    %3 = vector.load %arg3[%c0_2, %c0_3, %c0_4] : memref<1x8x32xf32, #tpu.memory_space<vmem>>, vector<1x8x32xf32>
    %4 = vector.shape_cast %3 : vector<1x8x32xf32> to vector<8x32xf32>
    %5 = arith.truncf %4 : vector<8x32xf32> to vector<8x32xbf16>
    %c0_5 = arith.constant 0 : index
    %c0_6 = arith.constant 0 : index
    %6 = vector.load %arg4[%c0_5, %c0_6] : memref<32x32xbf16, #tpu.memory_space<vmem>>, vector<32x32xbf16>
    %cst = arith.constant dense<0.000000e+00> : vector<8x32xf32>
    %7 = tpu.matmul %2, %6, %cst {dimension_numbers = #tpu.dot_dimension_numbers<[1], [0], [0], [1], [0, 0, 1, 1], [], []>} : vector<8x32xbf16>, vector<32x32xbf16>, vector<8x32xf32> -> vector<8x32xf32>
    %c0_7 = arith.constant 0 : index
    %c0_8 = arith.constant 0 : index
    %8 = vector.load %arg5[%c0_7, %c0_8] : memref<1x32xf32, #tpu.memory_space<vmem>>, vector<1x32xf32>
    %9 = vector.broadcast %8 : vector<1x32xf32> to vector<8x32xf32>
    %10 = arith.addf %7, %9 : vector<8x32xf32>
    %c0_9 = arith.constant 0 : index
    %c0_10 = arith.constant 0 : index
    %11 = vector.load %arg6[%c0_9, %c0_10] : memref<32x64xbf16, #tpu.memory_space<vmem>>, vector<32x64xbf16>
    %cst_11 = arith.constant dense<0.000000e+00> : vector<8x64xf32>
    %12 = tpu.matmul %5, %11, %cst_11 {dimension_numbers = #tpu.dot_dimension_numbers<[1], [0], [0], [1], [0, 0, 1, 1], [], []>} : vector<8x32xbf16>, vector<32x64xbf16>, vector<8x64xf32> -> vector<8x64xf32>
    %c0_12 = arith.constant 0 : index
    %c0_13 = arith.constant 0 : index
    %13 = vector.load %arg7[%c0_12, %c0_13] : memref<1x64xf32, #tpu.memory_space<vmem>>, vector<1x64xf32>
    %14 = vector.broadcast %13 : vector<1x64xf32> to vector<8x64xf32>
    %15 = arith.addf %12, %14 : vector<8x64xf32>
    %cst_14 = arith.constant 0.353553385 : f32
    %16 = vector.broadcast %cst_14 : f32 to vector<8x32xf32>
    %17 = arith.mulf %10, %16 : vector<8x32xf32>
    %18 = arith.truncf %17 : vector<8x32xf32> to vector<8x32xbf16>
    %19 = vector.extract_strided_slice %15 {offsets = [0, 0], sizes = [8, 32], strides = [1, 1]} : vector<8x64xf32> to vector<8x32xf32>
    %20 = arith.truncf %19 : vector<8x32xf32> to vector<8x32xbf16>
    %21 = vector.extract_strided_slice %15 {offsets = [0, 32], sizes = [8, 32], strides = [1, 1]} : vector<8x64xf32> to vector<8x32xf32>
    %22 = arith.truncf %21 : vector<8x32xf32> to vector<8x32xbf16>
    %c0_15 = arith.constant 0 : index
    %c0_16 = arith.constant 0 : index
    %23 = vector.load %arg8[%c0_15, %c0_16] : memref<32x32xbf16, #tpu.memory_space<vmem>>, vector<32x32xbf16>
    %cst_17 = arith.constant 0.000000e+00 : f32
    %24 = vector.broadcast %cst_17 : f32 to vector<8x32xf32>
    %25 = vector.extract_strided_slice %18 {offsets = [0, 0], sizes = [8, 8], strides = [1, 1]} : vector<8x32xbf16> to vector<8x8xbf16>
    %26 = vector.extract_strided_slice %20 {offsets = [0, 0], sizes = [8, 8], strides = [1, 1]} : vector<8x32xbf16> to vector<8x8xbf16>
    %27 = vector.extract_strided_slice %22 {offsets = [0, 0], sizes = [8, 8], strides = [1, 1]} : vector<8x32xbf16> to vector<8x8xbf16>
    "tpu.trace_start"() <{level = 10 : i32, message = "qd,kd->qk"}> : () -> ()
    %cst_18 = arith.constant dense<0.000000e+00> : vector<8x8xf32>
    %28 = tpu.matmul %25, %26, %cst_18 {dimension_numbers = #tpu.dot_dimension_numbers<[1], [1], [0], [0], [0, 0, 1, 0], [], []>} : vector<8x8xbf16>, vector<8x8xbf16>, vector<8x8xf32> -> vector<8x8xf32>
    "tpu.trace_stop"() : () -> ()
    %cst_19 = arith.constant dense<0xFF800000> : vector<8xf32>
    %29 = vector.multi_reduction <maximumf>, %28, %cst_19 [1] : vector<8x8xf32> to vector<8xf32>
    %30 = vector.shape_cast %29 : vector<8xf32> to vector<8x1xf32>
    %31 = vector.broadcast %30 : vector<8x1xf32> to vector<8x8xf32>
    %32 = arith.subf %28, %31 : vector<8x8xf32>
    %33 = math.exp %32 : vector<8x8xf32>
    %cst_20 = arith.constant dense<0.000000e+00> : vector<8xf32>
    %34 = vector.multi_reduction <add>, %33, %cst_20 [1] : vector<8x8xf32> to vector<8xf32>
    %35 = vector.shape_cast %34 : vector<8xf32> to vector<8x1xf32>
    %36 = tpu.reciprocal %35 {approx = true} : vector<8x1xf32> -> vector<8x1xf32>
    %37 = vector.broadcast %36 : vector<8x1xf32> to vector<8x8xf32>
    %38 = arith.mulf %33, %37 : vector<8x8xf32>
    %39 = arith.truncf %38 : vector<8x8xf32> to vector<8x8xbf16>
    %cst_21 = arith.constant dense<0.000000e+00> : vector<8x8xf32>
    %40 = tpu.matmul %39, %27, %cst_21 {dimension_numbers = #tpu.dot_dimension_numbers<[1], [0], [0], [1], [0, 0, 1, 1], [], []>} : vector<8x8xbf16>, vector<8x8xbf16>, vector<8x8xf32> -> vector<8x8xf32>
    %41 = arith.truncf %40 : vector<8x8xf32> to vector<8x8xbf16>
    %42 = vector.extract_strided_slice %23 {offsets = [0, 0], sizes = [8, 32], strides = [1, 1]} : vector<32x32xbf16> to vector<8x32xbf16>
    %cst_22 = arith.constant dense<0.000000e+00> : vector<8x32xf32>
    %43 = tpu.matmul %41, %42, %cst_22 {dimension_numbers = #tpu.dot_dimension_numbers<[1], [0], [0], [1], [0, 0, 1, 1], [], []>} : vector<8x8xbf16>, vector<8x32xbf16>, vector<8x32xf32> -> vector<8x32xf32>
    %44 = arith.addf %24, %43 : vector<8x32xf32>
    %45 = vector.extract_strided_slice %18 {offsets = [0, 8], sizes = [8, 8], strides = [1, 1]} : vector<8x32xbf16> to vector<8x8xbf16>
    %46 = vector.extract_strided_slice %20 {offsets = [0, 8], sizes = [8, 8], strides = [1, 1]} : vector<8x32xbf16> to vector<8x8xbf16>
    %47 = vector.extract_strided_slice %22 {offsets = [0, 8], sizes = [8, 8], strides = [1, 1]} : vector<8x32xbf16> to vector<8x8xbf16>
    "tpu.trace_start"() <{level = 10 : i32, message = "qd,kd->qk"}> : () -> ()
    %cst_23 = arith.constant dense<0.000000e+00> : vector<8x8xf32>
    %48 = tpu.matmul %45, %46, %cst_23 {dimension_numbers = #tpu.dot_dimension_numbers<[1], [1], [0], [0], [0, 0, 1, 0], [], []>} : vector<8x8xbf16>, vector<8x8xbf16>, vector<8x8xf32> -> vector<8x8xf32>
    "tpu.trace_stop"() : () -> ()
    %cst_24 = arith.constant dense<0xFF800000> : vector<8xf32>
    %49 = vector.multi_reduction <maximumf>, %48, %cst_24 [1] : vector<8x8xf32> to vector<8xf32>
    %50 = vector.shape_cast %49 : vector<8xf32> to vector<8x1xf32>
    %51 = vector.broadcast %50 : vector<8x1xf32> to vector<8x8xf32>
    %52 = arith.subf %48, %51 : vector<8x8xf32>
    %53 = math.exp %52 : vector<8x8xf32>
    %cst_25 = arith.constant dense<0.000000e+00> : vector<8xf32>
    %54 = vector.multi_reduction <add>, %53, %cst_25 [1] : vector<8x8xf32> to vector<8xf32>
    %55 = vector.shape_cast %54 : vector<8xf32> to vector<8x1xf32>
    %56 = tpu.reciprocal %55 {approx = true} : vector<8x1xf32> -> vector<8x1xf32>
    %57 = vector.broadcast %56 : vector<8x1xf32> to vector<8x8xf32>
    %58 = arith.mulf %53, %57 : vector<8x8xf32>
    %59 = arith.truncf %58 : vector<8x8xf32> to vector<8x8xbf16>
    %cst_26 = arith.constant dense<0.000000e+00> : vector<8x8xf32>
    %60 = tpu.matmul %59, %47, %cst_26 {dimension_numbers = #tpu.dot_dimension_numbers<[1], [0], [0], [1], [0, 0, 1, 1], [], []>} : vector<8x8xbf16>, vector<8x8xbf16>, vector<8x8xf32> -> vector<8x8xf32>
    %61 = arith.truncf %60 : vector<8x8xf32> to vector<8x8xbf16>
    %62 = vector.extract_strided_slice %23 {offsets = [8, 0], sizes = [8, 32], strides = [1, 1]} : vector<32x32xbf16> to vector<8x32xbf16>
    %cst_27 = arith.constant dense<0.000000e+00> : vector<8x32xf32>
    %63 = tpu.matmul %61, %62, %cst_27 {dimension_numbers = #tpu.dot_dimension_numbers<[1], [0], [0], [1], [0, 0, 1, 1], [], []>} : vector<8x8xbf16>, vector<8x32xbf16>, vector<8x32xf32> -> vector<8x32xf32>
    %64 = arith.addf %44, %63 : vector<8x32xf32>
    %65 = vector.extract_strided_slice %18 {offsets = [0, 16], sizes = [8, 8], strides = [1, 1]} : vector<8x32xbf16> to vector<8x8xbf16>
    %66 = vector.extract_strided_slice %20 {offsets = [0, 16], sizes = [8, 8], strides = [1, 1]} : vector<8x32xbf16> to vector<8x8xbf16>
    %67 = vector.extract_strided_slice %22 {offsets = [0, 16], sizes = [8, 8], strides = [1, 1]} : vector<8x32xbf16> to vector<8x8xbf16>
    "tpu.trace_start"() <{level = 10 : i32, message = "qd,kd->qk"}> : () -> ()
    %cst_28 = arith.constant dense<0.000000e+00> : vector<8x8xf32>
    %68 = tpu.matmul %65, %66, %cst_28 {dimension_numbers = #tpu.dot_dimension_numbers<[1], [1], [0], [0], [0, 0, 1, 0], [], []>} : vector<8x8xbf16>, vector<8x8xbf16>, vector<8x8xf32> -> vector<8x8xf32>
    "tpu.trace_stop"() : () -> ()
    %cst_29 = arith.constant dense<0xFF800000> : vector<8xf32>
    %69 = vector.multi_reduction <maximumf>, %68, %cst_29 [1] : vector<8x8xf32> to vector<8xf32>
    %70 = vector.shape_cast %69 : vector<8xf32> to vector<8x1xf32>
    %71 = vector.broadcast %70 : vector<8x1xf32> to vector<8x8xf32>
    %72 = arith.subf %68, %71 : vector<8x8xf32>
    %73 = math.exp %72 : vector<8x8xf32>
    %cst_30 = arith.constant dense<0.000000e+00> : vector<8xf32>
    %74 = vector.multi_reduction <add>, %73, %cst_30 [1] : vector<8x8xf32> to vector<8xf32>
    %75 = vector.shape_cast %74 : vector<8xf32> to vector<8x1xf32>
    %76 = tpu.reciprocal %75 {approx = true} : vector<8x1xf32> -> vector<8x1xf32>
    %77 = vector.broadcast %76 : vector<8x1xf32> to vector<8x8xf32>
    %78 = arith.mulf %73, %77 : vector<8x8xf32>
    %79 = arith.truncf %78 : vector<8x8xf32> to vector<8x8xbf16>
    %cst_31 = arith.constant dense<0.000000e+00> : vector<8x8xf32>
    %80 = tpu.matmul %79, %67, %cst_31 {dimension_numbers = #tpu.dot_dimension_numbers<[1], [0], [0], [1], [0, 0, 1, 1], [], []>} : vector<8x8xbf16>, vector<8x8xbf16>, vector<8x8xf32> -> vector<8x8xf32>
    %81 = arith.truncf %80 : vector<8x8xf32> to vector<8x8xbf16>
    %82 = vector.extract_strided_slice %23 {offsets = [16, 0], sizes = [8, 32], strides = [1, 1]} : vector<32x32xbf16> to vector<8x32xbf16>
    %cst_32 = arith.constant dense<0.000000e+00> : vector<8x32xf32>
    %83 = tpu.matmul %81, %82, %cst_32 {dimension_numbers = #tpu.dot_dimension_numbers<[1], [0], [0], [1], [0, 0, 1, 1], [], []>} : vector<8x8xbf16>, vector<8x32xbf16>, vector<8x32xf32> -> vector<8x32xf32>
    %84 = arith.addf %64, %83 : vector<8x32xf32>
    %85 = vector.extract_strided_slice %18 {offsets = [0, 24], sizes = [8, 8], strides = [1, 1]} : vector<8x32xbf16> to vector<8x8xbf16>
    %86 = vector.extract_strided_slice %20 {offsets = [0, 24], sizes = [8, 8], strides = [1, 1]} : vector<8x32xbf16> to vector<8x8xbf16>
    %87 = vector.extract_strided_slice %22 {offsets = [0, 24], sizes = [8, 8], strides = [1, 1]} : vector<8x32xbf16> to vector<8x8xbf16>
    "tpu.trace_start"() <{level = 10 : i32, message = "qd,kd->qk"}> : () -> ()
    %cst_33 = arith.constant dense<0.000000e+00> : vector<8x8xf32>
    %88 = tpu.matmul %85, %86, %cst_33 {dimension_numbers = #tpu.dot_dimension_numbers<[1], [1], [0], [0], [0, 0, 1, 0], [], []>} : vector<8x8xbf16>, vector<8x8xbf16>, vector<8x8xf32> -> vector<8x8xf32>
    "tpu.trace_stop"() : () -> ()
    %cst_34 = arith.constant dense<0xFF800000> : vector<8xf32>
    %89 = vector.multi_reduction <maximumf>, %88, %cst_34 [1] : vector<8x8xf32> to vector<8xf32>
    %90 = vector.shape_cast %89 : vector<8xf32> to vector<8x1xf32>
    %91 = vector.broadcast %90 : vector<8x1xf32> to vector<8x8xf32>
    %92 = arith.subf %88, %91 : vector<8x8xf32>
    %93 = math.exp %92 : vector<8x8xf32>
    %cst_35 = arith.constant dense<0.000000e+00> : vector<8xf32>
    %94 = vector.multi_reduction <add>, %93, %cst_35 [1] : vector<8x8xf32> to vector<8xf32>
    %95 = vector.shape_cast %94 : vector<8xf32> to vector<8x1xf32>
    %96 = tpu.reciprocal %95 {approx = true} : vector<8x1xf32> -> vector<8x1xf32>
    %97 = vector.broadcast %96 : vector<8x1xf32> to vector<8x8xf32>
    %98 = arith.mulf %93, %97 : vector<8x8xf32>
    %99 = arith.truncf %98 : vector<8x8xf32> to vector<8x8xbf16>
    %cst_36 = arith.constant dense<0.000000e+00> : vector<8x8xf32>
    %100 = tpu.matmul %99, %87, %cst_36 {dimension_numbers = #tpu.dot_dimension_numbers<[1], [0], [0], [1], [0, 0, 1, 1], [], []>} : vector<8x8xbf16>, vector<8x8xbf16>, vector<8x8xf32> -> vector<8x8xf32>
    %101 = arith.truncf %100 : vector<8x8xf32> to vector<8x8xbf16>
    %102 = vector.extract_strided_slice %23 {offsets = [24, 0], sizes = [8, 32], strides = [1, 1]} : vector<32x32xbf16> to vector<8x32xbf16>
    %cst_37 = arith.constant dense<0.000000e+00> : vector<8x32xf32>
    %103 = tpu.matmul %101, %102, %cst_37 {dimension_numbers = #tpu.dot_dimension_numbers<[1], [0], [0], [1], [0, 0, 1, 1], [], []>} : vector<8x8xbf16>, vector<8x32xbf16>, vector<8x32xf32> -> vector<8x32xf32>
    %104 = arith.addf %84, %103 : vector<8x32xf32>
    %c0_38 = arith.constant 0 : index
    %c0_39 = arith.constant 0 : index
    %105 = vector.load %arg9[%c0_38, %c0_39] : memref<1x32xf32, #tpu.memory_space<vmem>>, vector<1x32xf32>
    %106 = vector.broadcast %105 : vector<1x32xf32> to vector<8x32xf32>
    %107 = arith.addf %104, %106 : vector<8x32xf32>
    %108 = arith.addf %1, %107 : vector<8x32xf32>
    %c0_40 = arith.constant 0 : index
    %c0_41 = arith.constant 0 : index
    %109 = vector.load %arg10[%c0_40, %c0_41] : memref<1x32xf32, #tpu.memory_space<vmem>>, vector<1x32xf32>
    %c0_42 = arith.constant 0 : index
    %c0_43 = arith.constant 0 : index
    %110 = vector.load %arg11[%c0_42, %c0_43] : memref<1x32xf32, #tpu.memory_space<vmem>>, vector<1x32xf32>
    %cst_44 = arith.constant dense<0.000000e+00> : vector<8xf32>
    %111 = vector.multi_reduction <add>, %108, %cst_44 [1] : vector<8x32xf32> to vector<8xf32>
    %112 = vector.shape_cast %111 : vector<8xf32> to vector<8x1xf32>
    %cst_45 = arith.constant 3.200000e+01 : f32
    %113 = vector.broadcast %cst_45 : f32 to vector<8x1xf32>
    %114 = arith.divf %112, %113 : vector<8x1xf32>
    %115 = vector.broadcast %114 : vector<8x1xf32> to vector<8x32xf32>
    %116 = arith.subf %108, %115 : vector<8x32xf32>
    %117 = arith.mulf %116, %116 : vector<8x32xf32>
    %cst_46 = arith.constant dense<0.000000e+00> : vector<8xf32>
    %118 = vector.multi_reduction <add>, %117, %cst_46 [1] : vector<8x32xf32> to vector<8xf32>
    %119 = vector.shape_cast %118 : vector<8xf32> to vector<8x1xf32>
    %cst_47 = arith.constant 3.200000e+01 : f32
    %120 = vector.broadcast %cst_47 : f32 to vector<8x1xf32>
    %121 = arith.divf %119, %120 : vector<8x1xf32>
    %122 = vector.broadcast %114 : vector<8x1xf32> to vector<8x32xf32>
    %123 = arith.subf %108, %122 : vector<8x32xf32>
    %cst_48 = arith.constant 9.99999974E-6 : f32
    %124 = vector.broadcast %cst_48 : f32 to vector<8x1xf32>
    %125 = arith.addf %121, %124 : vector<8x1xf32>
    %126 = math.rsqrt %125 : vector<8x1xf32>
    %127 = vector.broadcast %126 : vector<8x1xf32> to vector<8x32xf32>
    %128 = arith.mulf %123, %127 : vector<8x32xf32>
    %129 = vector.broadcast %109 : vector<1x32xf32> to vector<8x32xf32>
    %130 = arith.mulf %128, %129 : vector<8x32xf32>
    %131 = vector.broadcast %110 : vector<1x32xf32> to vector<8x32xf32>
    %132 = arith.addf %130, %131 : vector<8x32xf32>
    %133 = arith.truncf %132 : vector<8x32xf32> to vector<8x32xbf16>
    %c0_49 = arith.constant 0 : index
    %c0_50 = arith.constant 0 : index
    %134 = vector.load %arg12[%c0_49, %c0_50] : memref<32x64xbf16, #tpu.memory_space<vmem>>, vector<32x64xbf16>
    %cst_51 = arith.constant dense<0.000000e+00> : vector<8x64xf32>
    %135 = tpu.matmul %133, %134, %cst_51 {dimension_numbers = #tpu.dot_dimension_numbers<[1], [0], [0], [1], [0, 0, 1, 1], [], []>} : vector<8x32xbf16>, vector<32x64xbf16>, vector<8x64xf32> -> vector<8x64xf32>
    %c0_52 = arith.constant 0 : index
    %c0_53 = arith.constant 0 : index
    %136 = vector.load %arg13[%c0_52, %c0_53] : memref<1x64xf32, #tpu.memory_space<vmem>>, vector<1x64xf32>
    %137 = vector.broadcast %136 : vector<1x64xf32> to vector<8x64xf32>
    %138 = arith.addf %135, %137 : vector<8x64xf32>
    %cst_54 = arith.constant 5.000000e-01 : f32
    %139 = vector.broadcast %cst_54 : f32 to vector<8x64xf32>
    %140 = arith.mulf %139, %138 : vector<8x64xf32>
    %cst_55 = arith.constant 0.707106769 : f32
    %141 = vector.broadcast %cst_55 : f32 to vector<8x64xf32>
    %142 = arith.mulf %138, %141 : vector<8x64xf32>
    %143 = math.erf %142 : vector<8x64xf32>
    %cst_56 = arith.constant 1.000000e+00 : f32
    %144 = vector.broadcast %cst_56 : f32 to vector<8x64xf32>
    %145 = arith.addf %144, %143 : vector<8x64xf32>
    %146 = arith.mulf %140, %145 : vector<8x64xf32>
    %147 = arith.truncf %146 : vector<8x64xf32> to vector<8x64xbf16>
    %c0_57 = arith.constant 0 : index
    %c0_58 = arith.constant 0 : index
    %148 = vector.load %arg14[%c0_57, %c0_58] : memref<64x32xbf16, #tpu.memory_space<vmem>>, vector<64x32xbf16>
    %cst_59 = arith.constant dense<0.000000e+00> : vector<8x32xf32>
    %149 = tpu.matmul %147, %148, %cst_59 {dimension_numbers = #tpu.dot_dimension_numbers<[1], [0], [0], [1], [0, 0, 1, 1], [], []>} : vector<8x64xbf16>, vector<64x32xbf16>, vector<8x32xf32> -> vector<8x32xf32>
    %c0_60 = arith.constant 0 : index
    %c0_61 = arith.constant 0 : index
    %150 = vector.load %arg15[%c0_60, %c0_61] : memref<1x32xf32, #tpu.memory_space<vmem>>, vector<1x32xf32>
    %151 = vector.broadcast %150 : vector<1x32xf32> to vector<8x32xf32>
    %152 = arith.addf %149, %151 : vector<8x32xf32>
    %153 = arith.addf %132, %152 : vector<8x32xf32>
    %c0_62 = arith.constant 0 : index
    %c0_63 = arith.constant 0 : index
    %154 = vector.load %arg16[%c0_62, %c0_63] : memref<1x32xf32, #tpu.memory_space<vmem>>, vector<1x32xf32>
    %c0_64 = arith.constant 0 : index
    %c0_65 = arith.constant 0 : index
    %155 = vector.load %arg17[%c0_64, %c0_65] : memref<1x32xf32, #tpu.memory_space<vmem>>, vector<1x32xf32>
    %cst_66 = arith.constant dense<0.000000e+00> : vector<8xf32>
    %156 = vector.multi_reduction <add>, %153, %cst_66 [1] : vector<8x32xf32> to vector<8xf32>
    %157 = vector.shape_cast %156 : vector<8xf32> to vector<8x1xf32>
    %cst_67 = arith.constant 3.200000e+01 : f32
    %158 = vector.broadcast %cst_67 : f32 to vector<8x1xf32>
    %159 = arith.divf %157, %158 : vector<8x1xf32>
    %160 = vector.broadcast %159 : vector<8x1xf32> to vector<8x32xf32>
    %161 = arith.subf %153, %160 : vector<8x32xf32>
    %162 = arith.mulf %161, %161 : vector<8x32xf32>
    %cst_68 = arith.constant dense<0.000000e+00> : vector<8xf32>
    %163 = vector.multi_reduction <add>, %162, %cst_68 [1] : vector<8x32xf32> to vector<8xf32>
    %164 = vector.shape_cast %163 : vector<8xf32> to vector<8x1xf32>
    %cst_69 = arith.constant 3.200000e+01 : f32
    %165 = vector.broadcast %cst_69 : f32 to vector<8x1xf32>
    %166 = arith.divf %164, %165 : vector<8x1xf32>
    %167 = vector.broadcast %159 : vector<8x1xf32> to vector<8x32xf32>
    %168 = arith.subf %153, %167 : vector<8x32xf32>
    %cst_70 = arith.constant 9.99999974E-6 : f32
    %169 = vector.broadcast %cst_70 : f32 to vector<8x1xf32>
    %170 = arith.addf %166, %169 : vector<8x1xf32>
    %171 = math.rsqrt %170 : vector<8x1xf32>
    %172 = vector.broadcast %171 : vector<8x1xf32> to vector<8x32xf32>
    %173 = arith.mulf %168, %172 : vector<8x32xf32>
    %174 = vector.broadcast %154 : vector<1x32xf32> to vector<8x32xf32>
    %175 = arith.mulf %173, %174 : vector<8x32xf32>
    %176 = vector.broadcast %155 : vector<1x32xf32> to vector<8x32xf32>
    %177 = arith.addf %175, %176 : vector<8x32xf32>
    %c0_71 = arith.constant 0 : index
    %c0_72 = arith.constant 0 : index
    %c0_73 = arith.constant 0 : index
    %178 = vector.load %arg18[%c0_71, %c0_72, %c0_73] : memref<1x8x32xf32, #tpu.memory_space<vmem>>, vector<1x8x32xf32>
    %179 = vector.shape_cast %178 : vector<1x8x32xf32> to vector<8x32xf32>
    %180 = vector.shape_cast %177 : vector<8x32xf32> to vector<1x8x32xf32>
    tpu.vector_store %arg18[%c0_71, %c0_72, %c0_73], %180 {strides = array<i32>} : memref<1x8x32xf32, #tpu.memory_space<vmem>>, vector<1x8x32xf32>,
    return
  }
  func.func @transform_0(%arg0: i32, %arg1: i32) -> (i32, i32, i32) {
    %c0_i32 = arith.constant 0 : i32
    %c0_i32_0 = arith.constant 0 : i32
    return %arg0, %arg1, %c0_i32 : i32, i32, i32
  }
  func.func @transform_1(%arg0: i32, %arg1: i32) -> (i32, i32, i32) {
    %c0_i32 = arith.constant 0 : i32
    %c0_i32_0 = arith.constant 0 : i32
    %c0_i32_1 = arith.constant 0 : i32
    return %arg0, %c0_i32, %c0_i32_0 : i32, i32, i32
  }
  func.func @transform_2(%arg0: i32, %arg1: i32) -> (i32, i32) {
    %c0_i32 = arith.constant 0 : i32
    %c0_i32_0 = arith.constant 0 : i32
    %c0_i32_1 = arith.constant 0 : i32
    return %c0_i32, %c0_i32_0 : i32, i32
  }
  func.func @transform_3(%arg0: i32, %arg1: i32) -> (i32, i32) {
    %c0_i32 = arith.constant 0 : i32
    %c0_i32_0 = arith.constant 0 : i32
    %c0_i32_1 = arith.constant 0 : i32
    return %c0_i32, %c0_i32_0 : i32, i32
  }
  func.func @transform_4(%arg0: i32, %arg1: i32) -> (i32, i32) {
    %c0_i32 = arith.constant 0 : i32
    %c0_i32_0 = arith.constant 0 : i32
    %c0_i32_1 = arith.constant 0 : i32
    return %c0_i32, %c0_i32_0 : i32, i32
  }
  func.func @transform_5(%arg0: i32, %arg1: i32) -> (i32, i32) {
    %c0_i32 = arith.constant 0 : i32
    %c0_i32_0 = arith.constant 0 : i32
    %c0_i32_1 = arith.constant 0 : i32
    return %c0_i32, %c0_i32_0 : i32, i32
  }
  func.func @transform_6(%arg0: i32, %arg1: i32) -> (i32, i32) {
    %c0_i32 = arith.constant 0 : i32
    %c0_i32_0 = arith.constant 0 : i32
    %c0_i32_1 = arith.constant 0 : i32
    return %c0_i32, %c0_i32_0 : i32, i32
  }
  func.func @transform_7(%arg0: i32, %arg1: i32) -> (i32, i32) {
    %c0_i32 = arith.constant 0 : i32
    %c0_i32_0 = arith.constant 0 : i32
    %c0_i32_1 = arith.constant 0 : i32
    return %c0_i32, %c0_i32_0 : i32, i32
  }
  func.func @transform_8(%arg0: i32, %arg1: i32) -> (i32, i32) {
    %c0_i32 = arith.constant 0 : i32
    %c0_i32_0 = arith.constant 0 : i32
    %c0_i32_1 = arith.constant 0 : i32
    return %c0_i32, %c0_i32_0 : i32, i32
  }
  func.func @transform_9(%arg0: i32, %arg1: i32) -> (i32, i32) {
    %c0_i32 = arith.constant 0 : i32
    %c0_i32_0 = arith.constant 0 : i32
    %c0_i32_1 = arith.constant 0 : i32
    return %c0_i32, %c0_i32_0 : i32, i32
  }
  func.func @transform_10(%arg0: i32, %arg1: i32) -> (i32, i32) {
    %c0_i32 = arith.constant 0 : i32
    %c0_i32_0 = arith.constant 0 : i32
    %c0_i32_1 = arith.constant 0 : i32
    return %c0_i32, %c0_i32_0 : i32, i32
  }
  func.func @transform_11(%arg0: i32, %arg1: i32) -> (i32, i32) {
    %c0_i32 = arith.constant 0 : i32
    %c0_i32_0 = arith.constant 0 : i32
    %c0_i32_1 = arith.constant 0 : i32
    return %c0_i32, %c0_i32_0 : i32, i32
  }
  func.func @transform_12(%arg0: i32, %arg1: i32) -> (i32, i32) {
    %c0_i32 = arith.constant 0 : i32
    %c0_i32_0 = arith.constant 0 : i32
    %c0_i32_1 = arith.constant 0 : i32
    return %c0_i32, %c0_i32_0 : i32, i32
  }
  func.func @transform_13(%arg0: i32, %arg1: i32) -> (i32, i32) {
    %c0_i32 = arith.constant 0 : i32
    %c0_i32_0 = arith.constant 0 : i32
    %c0_i32_1 = arith.constant 0 : i32
    return %c0_i32, %c0_i32_0 : i32, i32
  }
  func.func @transform_14(%arg0: i32, %arg1: i32) -> (i32, i32) {
    %c0_i32 = arith.constant 0 : i32
    %c0_i32_0 = arith.constant 0 : i32
    %c0_i32_1 = arith.constant 0 : i32
    return %c0_i32, %c0_i32_0 : i32, i32
  }
  func.func @transform_15(%arg0: i32, %arg1: i32) -> (i32, i32) {
    %c0_i32 = arith.constant 0 : i32
    %c0_i32_0 = arith.constant 0 : i32
    %c0_i32_1 = arith.constant 0 : i32
    return %c0_i32, %c0_i32_0 : i32, i32
  }
  func.func @transform_16(%arg0: i32, %arg1: i32) -> (i32, i32, i32) {
    %c0_i32 = arith.constant 0 : i32
    %c0_i32_0 = arith.constant 0 : i32
    return %arg0, %arg1, %c0_i32 : i32, i32, i32
  }
}

</mosaic_0001>

<bundles_post_ra>
// kernel: tpu_custom_call.1
= control target key start
LH: loop header
LB: loop body
LE: loop exit
PB: predicated region body
PF: predicated region fallthrough
CT: control target
= control target key end

     0   :  { %s2923_s0 = inlined_call_operand.vmem [shape: f32[2,8,32], index: 0, kind: input, shape index: {}]   ;;  %s2924_s1 = inlined_call_operand.vmem [shape: f32[2,8,32], index: 1, kind: input, shape index: {}]   ;;  %s2925_s2 = inlined_call_operand.vmem [shape: bf16[32,32], index: 2, kind: input, shape index: {}]   ;;  %s2926_s3 = inlined_call_operand.hbm [shape: f32[1,32], index: 3, kind: input, shape index: {}]   ;;  %s2927_s4 = inlined_call_operand.hbm [shape: bf16[32,64], index: 4, kind: input, shape index: {}]   ;;  %s2928_s5 = inlined_call_operand.hbm [shape: f32[1,64], index: 5, kind: input, shape index: {}]   ;;  %s2929_s6 = inlined_call_operand.hbm [shape: bf16[32,32], index: 6, kind: input, shape index: {}]   ;;  %s2930_s7 = inlined_call_operand.hbm [shape: f32[1,32], index: 7, kind: input, shape index: {}]   ;;  %s2931_s8 = inlined_call_operand.hbm [shape: f32[1,32], index: 8, kind: input, shape index: {}]   ;;  %s2932_s9 = inlined_call_operand.hbm [shape: f32[1,32], index: 9, kind: input, shape index: {}]   ;;  %s2933_s10 = inlined_call_operand.vmem [shape: bf16[32,64], index: 10, kind: input, shape index: {}]   ;;  %s2934_s11 = inlined_call_operand.vmem [shape: f32[1,64], index: 11, kind: input, shape index: {}]   ;;  %s2935_s12 = inlined_call_operand.vmem [shape: bf16[64,32], index: 12, kind: input, shape index: {}]   ;;  %s2936_s13 = inlined_call_operand.vmem [shape: f32[1,32], index: 13, kind: input, shape index: {}]   ;;  %s2937_s14 = inlined_call_operand.vmem [shape: f32[1,32], index: 14, kind: input, shape index: {}]   ;;  %s2938_s15 = inlined_call_operand.vmem [shape: f32[1,32], index: 15, kind: input, shape index: {}]   ;;  %s2939_s16 = inlined_call_operand.hbm [shape: f32[2,8,32], index: 16, kind: output, shape index: {}]  }
   0x1   :  { %2952 = sst [smem:[#allocation27_spill]] %s2923_s0 }
   0x2   :  { %2953 = sst [smem:[#allocation28_spill]] %s2924_s1 }
   0x3   :  { %2954 = sst [smem:[#allocation29_spill]] %s2938_s15 }
   0x4   :  { %2955 = sst [smem:[#allocation30_spill]] %s2939_s16 }
   0x5   :  { %21 = vsyncpa [#allocation3], 0 }
   0x6   :  { %22 = vsyncpa [#allocation6], 0 }
   0x7   :  { %23 = vsyncpa [#allocation9], 0 }
   0x8   :  { %24 = vsyncpa [#allocation12], 0 }
   0x9   :  { %25 = vsyncpa [#allocation4], 0 }
   0xa   :  { %27 = vsyncpa [#allocation4 + $0x1], 0  ;;  %s2575_s21 = smov 0   ;;  %s2577_s22 = smov 0  }
   0xb   :  { %s2579_s23 = smov 0   ;;  %s2581_s24 = smov 0  }
   0xc   :  { %s2583_s25 = smov 0   ;;  %s2585_s26 = smov 0  }
   0xd LB: > { %2956 = sst [smem:[#allocation20_spill]] %s2449_s21  ;;  %s1819_s27 = sadd.s32 4294967295, %s2469_s26   ;;  %s2469_s26 = sphi %s2585_s26, %s33_s26   ;;  %s2465_s25 = sphi %s2583_s25, %s2983_s25   ;;  %s2461_s24 = sphi %s2581_s24, %s2986_s24   ;;  %s2457_s23 = sphi %s2579_s23, %s2981_s23   ;;  %s2453_s22 = sphi %s2577_s22, %s2985_s22   ;;  %s2449_s21 = sphi %s2575_s21, %s2984_s21  }
   0xe   : > { %2957 = sst [smem:[#allocation21_spill]] %s2457_s23  ;;  %s1820_s28 = sadd.s32 4294967294, %s2469_s26  }
   0xf   : > { %2958 = sst [smem:[#allocation22_spill]] %s2465_s25  ;;  %s45_s29 = sadd.s32 1, %s2465_s25 }
  0x10   : > { %2959 = sst [smem:[#allocation23_spill]] %s2469_s26  ;;  %s402_s30 = sadd.s32 1, %s2457_s23 }
  0x11   : > { %p47_p0 = scmp.ge.s32.totalorder %s45_s29, 2  ;;  %p412_p1 = scmp.ne.s32.totalorder %s2457_s23, %s2453_s22 }
  0x12   : > { %p413_p2 = scmp.eq.s32.totalorder %s1819_s27, 1  ;;  %p418_p3 = scmp.ne.s32.totalorder %s2453_s22, %s2449_s21 }
  0x13   : > { %s2988_s29 = smov (%p47_p0, %s45_s29), 0  ;;  %p419_p5 = scmp.eq.s32.totalorder %s1820_s28, 1 }
  0x14   : > { %2960 = sst [smem:[#allocation24_spill]] %s2988_s29  ;;  %p2615_p4 = por %p413_p2, %p412_p1 }
  0x15   : > { %s397_s17 = ssub.s32 %s2465_s25, %s2988_s29  ;;  %p1821_p6 = scmp.ge.s32.totalorder %s2469_s26, 1 }
  0x16   : > { %s2961_s0 = scalar_select %p2615_p4, 1, 0 }
  0x17   : > { %p400_p7 = scmp.eq.s32.totalorder %s397_s17, 0  ;;  %p2622_p8 = por %p419_p5, %p418_p3 }
  0x18   : > { %p426_p9 = scmp.lt.s32.totalorder %s2469_s26, 3  ;;  %p2634_p11 = scmp.eq.s32.totalorder %s1819_s27, 0 }
  0x19   : > { %s2962_s18 = scalar_select %p2622_p8, 1, 0 }
  0x1a   : > { %s2628_s19 = scalar_select %p400_p7, %s2457_s23, %s402_s30  }
  0x1b   : > { %2963 = sst [smem:[#allocation25_spill]] %s2962_s18  ;;  %p2630_p10 = pnand %p1821_p6, %p426_p9 }
  0x1c   : > { %2964 = sst [smem:[#allocation26_spill]] %s2628_s19  ;;  %s2471_s28 = smov [#allocation5]  }
  0x1d   : > { %s2965_s20 = scalar_select %p2630_p10, 1, 0 }
  0x1e   : > { %s2966_s21 = scalar_select %p2634_p11, 1, 0 }
  0x1f   : > { %p2056_p12 = pneg %p2630_p10  ;;  %s452_s17 = sshll.u32 %s2471_s28, 4  ;;  %s453_s17 = int_to_ptr.vmem [resolvable:$true] %s452_s17 }
  0x20   : > { %s2472_s30 = smov [#allocation8]   ;;  %s2206_s19 = scalar_lea.vmem %s453_s17, 256 }
  0x21   : > { %p2642_p13 = pnand %p2634_p11, %p2056_p12  ;;  %s476_s25 = sshll.u32 %s2472_s30, 4  ;;  %s477_s25 = int_to_ptr.vmem [resolvable:$true] %s476_s25 }
  0x22   : > { %p2207_p1 = scmp.ne.s32.totalorder %s453_s17, %s2206_s19  ;;  %p2214_p5 = scmp.lt.s32.totalorder %s453_s17, %s453_s17 }
  0x23   : > { %p2648_p0 = pneg %p2642_p13  ;;  %p2215_p6 = scmp.lt.s32.totalorder %s2206_s19, %s2206_s19 }
  0x25   : > { %p2209_p2 = pnand %p2207_p1, %p2648_p0  ;;  %p2216_p7 = por %p2215_p6, %p2214_p5 }
  0x27   : > { %p2210_p3 = pneg %p2209_p2 }
  0x29   : > { %p2217_p9 = pnand %p2216_p7, %p2210_p3 }
  0x2b   : > { %2220 = shalt.err (!%p2217_p9)
}
  0x2c   : > { %s2473_s28 = smov 64   ;;  %s2474_s30 = smov 4  }
  0x2d   : > { %2062 = dma.hbm_to_vmem [thread:$0]  (!%p2642_p13), %s2927_s4, 256, %s453_s17, [#allocation6], %s2473_s28, %s2473_s28, %s2474_s30  }
  0x2e   : > { %s2232_s26 = scalar_lea.vmem %s477_s25, 256  ;;  %p2240_p2 = scmp.lt.s32.totalorder %s477_s25, %s477_s25 }
  0x2f   : > { %p2233_p12 = scmp.ne.s32.totalorder %s477_s25, %s2232_s26  ;;  %p2241_p4 = scmp.lt.s32.totalorder %s2232_s26, %s2232_s26 }
  0x31   : > { %p2235_p8 = pnand %p2233_p12, %p2648_p0  ;;  %p2242_p11 = por %p2241_p4, %p2240_p2 }
  0x33   : > { %p2236_p1 = pneg %p2235_p8 }
  0x35   : > { %p2243_p5 = pnand %p2242_p11, %p2236_p1 }
  0x37   : > { %2246 = shalt.err (!%p2243_p5)
}
  0x38   : > { %2068 = dma.hbm_to_vmem [thread:$0]  (!%p2642_p13), %s2929_s6, 256, %s477_s25, [#allocation9], %s2473_s28, %s2473_s28, %s2474_s30  }
  0x39   : > { %s2475_s15 = smov [#allocation11]  }
  0x3a   : > { %s501_s23 = sshll.u32 %s2475_s15, 4  ;;  %s502_s23 = int_to_ptr.vmem [resolvable:$true] %s501_s23 }
  0x3b   : > { %s2258_s18 = scalar_lea.vmem %s502_s23, 16  ;;  %s2265_s17 = scalar_lea.vmem %s502_s23, 32 }
  0x3c   : > { %p2259_p3 = scmp.ne.s32.totalorder %s502_s23, %s2258_s18  ;;  %p2266_p7 = scmp.lt.s32.totalorder %s502_s23, %s502_s23 }
  0x3d   : > { %p2267_p4 = scmp.lt.s32.totalorder %s2265_s17, %s2258_s18 }
  0x3e   : > { %p2261_p6 = pnand %p2259_p3, %p2648_p0 }
  0x3f   : > { %p2268_p11 = por %p2267_p4, %p2266_p7 }
  0x40   : > { %p2262_p8 = pneg %p2261_p6 }
  0x42   : > { %p2269_p9 = pnand %p2268_p11, %p2262_p8 }
  0x44   : > { %2272 = shalt.err (!%p2269_p9)
}
  0x45   : > { %2074 = dma.hbm_to_vmem [thread:$0]  (!%p2642_p13), %s2931_s8, 16, %s502_s23, [#allocation12]  }
  0x46   : > { %s2476_s15 = smov [#allocation2]   ;;  %s2477_s28 = smov [#allocation7]  }
  0x47   : > { %s442_s25 = sshll.u32 %s2476_s15, 4  ;;  %s466_s30 = sshll.u32 %s2477_s28, 4  ;;  %s443_s25 = int_to_ptr.vmem [resolvable:$true] %s442_s25  ;;  %s467_s30 = int_to_ptr.vmem [resolvable:$true] %s466_s30 }
  0x48   : > { %s2284_s19 = scalar_lea.vmem %s443_s25, 16  ;;  %s2291_s18 = scalar_lea.vmem %s443_s25, 32 }
  0x49   : > { %p2285_p12 = scmp.ne.s32.totalorder %s443_s25, %s2284_s19  ;;  %p2292_p5 = scmp.lt.s32.totalorder %s443_s25, %s443_s25 }
  0x4a   : > { %p2293_p3 = scmp.lt.s32.totalorder %s2291_s18, %s2284_s19 }
  0x4b   : > { %p2287_p1 = pnand %p2285_p12, %p2648_p0 }
  0x4c   : > { %p2294_p6 = por %p2293_p3, %p2292_p5 }
  0x4d   : > { %p2288_p2 = pneg %p2287_p1 }
  0x4f   : > { %p2295_p8 = pnand %p2294_p6, %p2288_p2 }
  0x51   : > { %2298 = shalt.err (!%p2295_p8)
}
  0x52   : > { %2059 = dma.hbm_to_vmem [thread:$0]  (!%p2642_p13), %s2926_s3, 16, %s443_s25, [#allocation3]  }
  0x53   : > { %s2310_s26 = scalar_lea.vmem %s467_s30, 16  ;;  %s2317_s16 = scalar_lea.vmem %s467_s30, 32 }
  0x54   : > { %p2311_p7 = scmp.ne.s32.totalorder %s467_s30, %s2310_s26  ;;  %p2318_p9 = scmp.lt.s32.totalorder %s467_s30, %s467_s30 }
  0x55   : > { %p2319_p12 = scmp.lt.s32.totalorder %s2317_s16, %s2310_s26 }
  0x56   : > { %p2313_p4 = pnand %p2311_p7, %p2648_p0 }
  0x57   : > { %p2320_p1 = por %p2319_p12, %p2318_p9 }
  0x58   : > { %p2314_p11 = pneg %p2313_p4 }
  0x5a   : > { %p2321_p10 = pnand %p2320_p1, %p2314_p11 }
  0x5c   : > { %2324 = shalt.err (!%p2321_p10)
}
  0x5d   : > { %2065 = dma.hbm_to_vmem [thread:$0]  (!%p2642_p13), %s2928_s5, 16, %s467_s30, [#allocation6]  }
  0x5e   : > { %s2478_s19 = smov [#allocation10]   ;;  %s2479_s18 = smov [#allocation13]  }
  0x5f   : > { %s490_s25 = sshll.u32 %s2478_s19, 4  ;;  %s512_s23 = sshll.u32 %s2479_s18, 4  ;;  %s491_s25 = int_to_ptr.vmem [resolvable:$true] %s490_s25  ;;  %s513_s23 = int_to_ptr.vmem [resolvable:$true] %s512_s23 }
  0x60   : > { %s2336_s17 = scalar_lea.vmem %s491_s25, 16  ;;  %s2343_s26 = scalar_lea.vmem %s491_s25, 32 }
  0x61   : > { %p2337_p2 = scmp.ne.s32.totalorder %s491_s25, %s2336_s17  ;;  %p2344_p10 = scmp.lt.s32.totalorder %s491_s25, %s491_s25 }
  0x62   : > { %p2345_p6 = scmp.lt.s32.totalorder %s2343_s26, %s2336_s17 }
  0x63   : > { %p2339_p5 = pnand %p2337_p2, %p2648_p0 }
  0x64   : > { %p2346_p8 = por %p2345_p6, %p2344_p10 }
  0x65   : > { %p2340_p3 = pneg %p2339_p5 }
  0x67   : > { %p2347_p7 = pnand %p2346_p8, %p2340_p3 }
  0x69   : > { %2350 = shalt.err (!%p2347_p7)
}
  0x6a   : > { %2071 = dma.hbm_to_vmem [thread:$0]  (!%p2642_p13), %s2930_s7, 16, %s491_s25, [#allocation9]  }
  0x6b   : > { %s2362_s15 = scalar_lea.vmem %s513_s23, 16  ;;  %s2369_s28 = scalar_lea.vmem %s513_s23, 32 }
  0x6c   : > { %p2363_p4 = scmp.ne.s32.totalorder %s513_s23, %s2362_s15  ;;  %p2370_p12 = scmp.lt.s32.totalorder %s513_s23, %s513_s23 }
  0x6d   : > { %p2371_p1 = scmp.lt.s32.totalorder %s2369_s28, %s2362_s15 }
  0x6e   : > { %p2365_p11 = pnand %p2363_p4, %p2648_p0 }
  0x6f   : > { %p2372_p2 = por %p2371_p1, %p2370_p12 }
  0x70   : > { %p2366_p9 = pneg %p2365_p11 }
  0x72   : > { %p2373_p5 = pnand %p2372_p2, %p2366_p9 }
  0x74   : > { %2376 = shalt.err (!%p2373_p5)
}
  0x75   : > { %2077 = dma.hbm_to_vmem [thread:$0]  (!%p2642_p13), %s2932_s9, 16, %s513_s23, [#allocation12]  }
  0x76   : > { %p2969_p3 = scmp.ne.s32.totalorder %s2965_s20, 0 }
  0x77   : > { %p2970_p10 = scmp.ne.s32.totalorder (!%p2969_p3), %s2966_s21, 0 }
  0x78   : > { %560 = sbr.rel (%p2969_p3) target bundleno = 3634 (0xe32), region = 84 }
  0x7d   : > { %2428 = dma.done.wait (%p2970_p10), [#allocation3], 16  }
  0x7e   : > { %2430 = vsyncadd (%p2970_p10), [#allocation3], 4294967280 }
  0x7f   : > { %2432 = dma.done.wait (%p2970_p10), [#allocation6], 272  }
  0x80   : > { %2434 = vsyncadd (%p2970_p10), [#allocation6], 4294967024 }
  0x81   : > { %2436 = dma.done.wait (%p2970_p10), [#allocation9], 272  }
  0x82   : > { %2438 = vsyncadd (%p2970_p10), [#allocation9], 4294967024 }
  0x83   : > { %2440 = dma.done.wait (%p2970_p10), [#allocation12], 32  }
  0x84   : > { %2442 = vsyncadd (%p2970_p10), [#allocation12], 4294967264  ;;  %p640_p13 = scmp.lt.s32.totalorder %s2461_s24, 1  ;;  %v2480_v0 = vmov 0.0   ;;  %vm2481_vm0 = vmmov 0   ;;  %v2163_v1 = vld [vmem:[#allocation5 + $0x8] sm:$0xff]  }
  0x85   : > { %1926 = vmatprep.subr.bf16.mxu1 %v2480_v0  ;;  %1918 = vmatprep.subr.bf16.mxu0 %v2480_v0  ;;  %v2164_v2 = vld [vmem:[%s2925_s2 + $0x8] sm:$0xff]   ;;  %s2971_s1 = sld [smem:[#allocation28_spill]]  ;;  %v2166_v4 = vld [vmem:[%s2925_s2] sm:$0xff]   ;;  %vm679_vm1 = vcmask 261120   ;;  %v1845_v9 = vld [vmem:[#allocation7] ss:$0 sm:$0xff] }
  0x86   : > { %1930 = vmatprep.mubr.msk.bf16.mxu1 %vm2481_vm0, %v2480_v0  ;;  %1922 = vmatprep.mubr.msk.bf16.mxu0 %vm2481_vm0, %v2480_v0  ;;  %s641_s29 = scalar_select %p640_p13, %s2461_s24, 1  ;;  %v2165_v3 = vld [vmem:[#allocation5] sm:$0xff]   ;;  %v1841_v10 = vld [vmem:[#allocation2] ss:$0 sm:$0xff]  ;;  %vm796_vm2 = vcmask 64512   ;;  %vm861_vm3 = vcmask 1043456  }
  0x87   : > { %s2972_s16 = sld [smem:[#allocation27_spill]]  ;;  %1927 = vmatpush3.bf16.msra.mxu1 %v2163_v1  ;;  %1919 = vmatpush3.bf16.msra.mxu0 %v2164_v2  ;;  %s2482_s18 = smov 120   ;;  %v793_v54 = vld [vmem:[#allocation8 + $0x4] sm:$0xf]  ;;  %v792_v60 = vld [vmem:[#allocation8] sm:$0xf] }
  0x88   : > { %s1839_s20 = sshll.u32 %s641_s29, 3  ;;  %1928 = vmatprep.subr.bf16.mxu1 %v2480_v0  ;;  %1920 = vmatprep.subr.bf16.mxu0 %v2480_v0  ;;  %s2483_s29 = smov 96   ;;  %v1022_v55 = vsel %vm861_vm3, %v793_v54, 0  ;;  %v1068_v63 = vsel %vm861_vm3, %v792_v60, 0  ;;  %vm1577_vm4 = vcmask 523264  }
  0x89   : > { %s2485_s21 = smov 112   ;;  %s2486_s27 = smov 80  }
  0x8a   : > { %s2487_s25 = smov 104   ;;  %s2488_s23 = smov 72  }
  0x8b   : > { %s650_s17 = scalar_lea.vmem %s2971_s1, %s1839_s20  ;;  %1929 = vmatpush3.bf16.msra.mxu1 %v2165_v3  ;;  %1921 = vmatpush3.bf16.msra.mxu0 %v2166_v4  ;;  %s637_s30 = sand.u32 1, %s2453_s22  }
  0x8c   : > { %v654_v5 = vld [vmem:[%s650_s17] sm:$0xff]  ;;  %1940 = vmatprep.subr.bf16.mxu1 %v2480_v0  ;;  %1934 = vmatprep.subr.bf16.mxu0 %v2480_v0  ;;  %s2974_s17 = sld [smem:[#allocation30_spill]]  ;;  %s1653_s1 = scalar_lea.sflag [#allocation4], %s637_s30 }
  0x8d   : > { %s646_s15 = scalar_lea.vmem %s2972_s16, %s1839_s20  ;;  %v655_v7 = vpack.c.bf16 %v654_v5, %v654_v5  ;;  %s2484_s20 = smov 88  }
  0x8e   : > { %v2741_v6 = vld [vmem:[%s646_s15] sm:$0xff]  ;;  %s1838_s16 = sshll.u32 %s637_s30, 3  ;;  %p2975_p6 = scmp.ne.s32.totalorder %s2961_s0, 0 }
  0x8f   : > { %v653_v8 = vpack.c.bf16 %v2741_v6, %v2741_v6  ;;  %1931 = vmatmul.mubr.msk.bf16.vlgmr.msra.gmra.mxu1 %vm679_vm1, %v655_v7  ;;  %s2489_s28 = smov [#allocation14]  }
  0x90   : > { %1942 = vmatprep.mubr.msk.bf16.mxu1 %vm2481_vm0, %v2480_v0  ;;  %s2381_s19 = sshll.u32 %s2489_s28, 4  ;;  %s2382_s19 = int_to_ptr.vmem [resolvable:$false] %s2381_s19 }
  0x91   : > { %1923 = vmatmul.mubr.msk.bf16.vlgmr.msra.gmra.mxu0 %vm679_vm1, %v653_v8 }
  0x92   : > { %1936 = vmatprep.mubr.msk.bf16.mxu0 %vm2481_vm0, %v2480_v0 }
 0x14f   : > { %v783_v11 = vpop.f32.mrf.mxu1 }
 0x150   : > { %v784_v12 = vadd.f32 %v1845_v9, %v783_v11 }
 0x151   : > { %v717_v13 = vpop.f32.mrf.mxu0  ;;  %v1932_v15 = vpop.f32.mrf.mxu1 }
 0x152   : > { %v718_v14 = vadd.f32 %v1841_v10, %v717_v13  ;;  %v2753_v16 = vpack.c.bf16 %v784_v12, %v784_v12 }
 0x153   : > { %v1924_v17 = vpop.f32.mrf.mxu0  ;;  %v786_v19 = vpop.f32.mrf.mxu1 }
 0x154   : > { %v789_v18 = vmul.f32 0.35355338, %v718_v14  ;;  %909 = vrot.lane.b32.xlu0 %v2753_v16, %s2482_s18  ;;  %v801_v21 = vsel %vm796_vm2, %v2753_v16, 0 }
 0x155   : > { %v720_v20 = vpop.f32.mrf.mxu0  ;;  %v1933_v23 = vpop.f32.mrf.mxu1  ;;  %1935 = vmatpush3.bf16.xpose.msra.mxu0 %v801_v21 }
 0x156   : > { %v2758_v22 = vpack.c.bf16 %v789_v18, %v789_v18  ;;  %1946 = vmatprep.subr.bf16.mxu0 %v2480_v0 }
 0x157   : > { %v1925_v24 = vpop.f32.mrf.mxu0 }
 0x158   : > { %907 = vrot.lane.b32.xlu0 %v2758_v22, %s2482_s18 }
 0x15c   : > { %1937 = vmatmul.mubr.msk.bf16.vlgmr.msra.gmra.mxu0 %vm796_vm2, %v2758_v22 }
 0x15d   : > { %1948 = vmatprep.mubr.msk.bf16.mxu0 %vm2481_vm0, %v2480_v0 }
 0x1c6   : > { %v910_v25 = vpop.permute.xlu0 %909 }
 0x1c7   : > { %v915_v26 = vsel %vm796_vm2, %v910_v25, 0 }
 0x1c8   : > { %1947 = vmatpush3.bf16.xpose.msra.mxu0 %v915_v26 }
 0x1c9   : > { %1958 = vmatprep.subr.bf16.mxu0 %v2480_v0 }
 0x1ca   : > { %v908_v27 = vpop.permute.xlu0 %907 }
 0x1cf   : > { %1949 = vmatmul.mubr.msk.bf16.vlgmr.msra.gmra.mxu0 %vm796_vm2, %v908_v27 }
 0x1d0   : > { %1960 = vmatprep.mubr.msk.bf16.mxu0 %vm2481_vm0, %v2480_v0  ;;  %1959 = vmatpush3.bf16.msra.mxu0 %v1022_v55 }
 0x1d1   : > { %1970 = vmatprep.subr.bf16.mxu0 %v2480_v0 }
 0x21c   : > { %v837_v28 = vpop.f32.mrf.mxu0 }
 0x21d   : > { %v843_v29 = vsel %vm796_vm2, %v837_v28, -inf }
 0x21e   : > { %844 = vmax.xlane.f32.xlu1 %v843_v29  ;;  %v1938_v30 = vpop.f32.mrf.mxu0 }
 0x220   : > { %v840_v31 = vpop.f32.mrf.mxu0 }
 0x222   : > { %v1939_v32 = vpop.f32.mrf.mxu0 }
 0x28f   : > { %v951_v33 = vpop.f32.mrf.mxu0 }
 0x290   : > { %v957_v34 = vsel %vm796_vm2, %v951_v33, -inf }
 0x291   : > { %958 = vmax.xlane.f32.xlu1 %v957_v34  ;;  %v1950_v35 = vpop.f32.mrf.mxu0 }
 0x293   : > { %v954_v36 = vpop.f32.mrf.mxu0 }
 0x295   : > { %v1951_v37 = vpop.f32.mrf.mxu0 }
 0x2a2   : > { %856 = vrot.lane.b32.xlu1 %v2753_v16, %s2483_s29  ;;  %s2973_s29 = sld [smem:[#allocation29_spill]] }
 0x2a7   : > { %v845_v38 = vpop.xlane.xlu1 %844 }
 0x2a8   : > { %v846_v39 = vsub.f32 %v837_v28, %v845_v38 }
 0x2aa   : > { %v847_v40 = vmul.f32 1.442695, %v846_v39 }
 0x2ac   : > { %2173 = vpow2.f32 %v847_v40 }
 0x2b9   : > { %v2174_v41 = vpop.eup %2173 }
 0x2ba   : > { %v849_v42 = vsel %vm796_vm2, %v2174_v41, 0.0 }
 0x2bb   : > { %850 = vadd.xlane.f32.xlu0 %v849_v42 }
 0x31a   : > { %v959_v43 = vpop.xlane.xlu1 %958 }
 0x31b   : > { %v960_v44 = vsub.f32 %v951_v33, %v959_v43  ;;  %v794_v43 = vld [vmem:[#allocation8 + $0x8] sm:$0xf] }
 0x31d   : > { %v961_v45 = vmul.f32 1.442695, %v960_v44  ;;  %v1225_v44 = vsel %vm861_vm3, %v794_v43, 0  ;;  %v2170_v43 = vld [vmem:[%s2935_s12 + $0x10] sm:$0xff]  }
 0x31e   : > { %v857_v46 = vpop.permute.xlu1 %856 }
 0x31f   : > { %2175 = vpow2.f32 %v961_v45  ;;  %v863_v47 = vsel %vm861_vm3, %v857_v46, 0 }
 0x320   : > { %1941 = vmatpush3.bf16.msra.mxu1 %v863_v47 }
 0x321   : > { %1952 = vmatprep.subr.bf16.mxu1 %v2480_v0 }
 0x32c   : > { %v2176_v48 = vpop.eup %2175 }
 0x32d   : > { %v963_v49 = vsel %vm796_vm2, %v2176_v48, 0.0 }
 0x32e   : > { %964 = vadd.xlane.f32.xlu1 %v963_v49 }
 0x33f   : > { %969 = vrot.lane.b32.xlu1 %v2753_v16, %s2484_s20  ;;  %s1877_s20 = sshll.u32 %s2461_s24, 7  ;;  %s2383_s24 = scalar_lea.vmem %s2382_s19, 256 }
 0x340   : > { %s1665_s26 = scalar_lea.hbm %s2974_s17, %s1877_s20 }
 0x343   : > { %1112 = vrot.lane.b32.xlu1 %v2753_v16, %s2485_s21 }
 0x344   : > { %v851_v50 = vpop.xlane.xlu0 %850 }
 0x345   : > { %2177 = vrcp.f32 %v851_v50 }
 0x347   : > { %1110 = vrot.lane.b32.xlu1 %v2758_v22, %s2485_s21  ;;  %s639_s21 = scalar_lea.vmem [#allocation14], %s1838_s16 }
 0x352   : > { %v2178_v51 = vpop.eup %2177 }
 0x353   : > { %v853_v52 = vmul.f32 %v2178_v51, %v2174_v41 }
 0x355   : > { %v854_v53 = vpack.c.bf16 %v853_v52, %v853_v52 }
 0x357   : > { %1943 = vmatmul.mubr.msk.bf16.vlgmr.msra.gmra.mxu1 %vm796_vm2, %v854_v53 }
 0x358   : > { %1954 = vmatprep.mubr.msk.bf16.mxu1 %vm2481_vm0, %v2480_v0 }
 0x3b7   : > { %v965_v56 = vpop.xlane.xlu1 %964 }
 0x3b8   : > { %2179 = vrcp.f32 %v965_v56 }
 0x3bb   : > { %v970_v57 = vpop.permute.xlu1 %969 }
 0x3bc   : > { %v975_v58 = vsel %vm861_vm3, %v970_v57, 0 }
 0x3bd   : > { %1953 = vmatpush3.bf16.msra.mxu1 %v975_v58 }
 0x3be   : > { %1964 = vmatprep.subr.bf16.mxu1 %v2480_v0 }
 0x3bf   : > { %v1113_v7 = vpop.permute.xlu1 %1112 }
 0x3c0   : > { %v1118_v11 = vsel %vm796_vm2, %v1113_v7, 0 }
 0x3c3   : > { %v1111_v14 = vpop.permute.xlu1 %1110 }
 0x3c5   : > { %v2180_v59 = vpop.eup %2179 }
 0x3c6   : > { %v967_v61 = vmul.f32 %v2180_v59, %v2176_v48 }
 0x3c8   : > { %v968_v62 = vpack.c.bf16 %v967_v61, %v967_v61 }
 0x3ca   : > { %1955 = vmatmul.mubr.msk.bf16.vlgmr.msra.gmra.mxu1 %vm796_vm2, %v968_v62  ;;  %v795_v62 = vld [vmem:[#allocation8 + $0xc] sm:$0xf] }
 0x3cb   : > { %1965 = vmatpush3.bf16.msra.mxu1 %v1068_v63  ;;  %1966 = vmatprep.mubr.msk.bf16.mxu1 %vm2481_vm0, %v2480_v0 }
 0x3cc   : > { %1976 = vmatprep.subr.bf16.mxu1 %v2480_v0 }
 0x417   : > { %v899_v1 = vpop.f32.mrf.mxu1 }
 0x418   : > { %v905_v2 = vpack.c.bf16 %v899_v1, %v899_v1  ;;  %v1383_v1 = vsel %vm861_vm3, %v795_v62, 0 }
 0x419   : > { %v1944_v3 = vpop.f32.mrf.mxu1 }
 0x41a   : > { %1967 = vmatmul.mubr.msk.bf16.vlgmr.msra.gmra.mxu1 %vm796_vm2, %v905_v2 }
 0x41b   : > { %v902_v4 = vpop.f32.mrf.mxu1  ;;  %1978 = vmatprep.mubr.msk.bf16.mxu1 %vm2481_vm0, %v2480_v0 }
 0x41d   : > { %v1945_v5 = vpop.f32.mrf.mxu1 }
 0x48a   : > { %v1011_v8 = vpop.f32.mrf.mxu1 }
 0x48b   : > { %v1017_v9 = vpack.c.bf16 %v1011_v8, %v1011_v8 }
 0x48c   : > { %v1956_v10 = vpop.f32.mrf.mxu1 }
 0x48d   : > { %1961 = vmatmul.mubr.msk.bf16.vlgmr.msra.gmra.mxu0 %vm796_vm2, %v1017_v9 }
 0x48e   : > { %1971 = vmatpush3.bf16.xpose.msra.mxu0 %v1118_v11  ;;  %v1014_v12 = vpop.f32.mrf.mxu1  ;;  %1972 = vmatprep.mubr.msk.bf16.mxu0 %vm2481_vm0, %v2480_v0 }
 0x48f   : > { %1982 = vmatprep.subr.bf16.mxu0 %v2480_v0 }
 0x490   : > { %v1957_v13 = vpop.f32.mrf.mxu1 }
 0x495   : > { %1973 = vmatmul.mubr.msk.bf16.vlgmr.msra.gmra.mxu0 %vm796_vm2, %v1111_v14 }
 0x496   : > { %1984 = vmatprep.mubr.msk.bf16.mxu0 %vm2481_vm0, %v2480_v0  ;;  %1983 = vmatpush3.bf16.msra.mxu0 %v1225_v44  ;;  %v2171_v44 = vld [vmem:[%s2935_s12 + $0x8] sm:$0xff]  }
 0x497   : > { %1994 = vmatprep.subr.bf16.mxu0 %v2480_v0 }
 0x4da   : > { %v2804_v15 = vpop.f32.mrf.mxu1 }
 0x4dc   : > { %v1968_v17 = vpop.f32.mrf.mxu1 }
 0x4de   : > { %v1107_v18 = vpop.f32.mrf.mxu1 }
 0x4df   : > { %v1861_v18 = vld [vmem:[#allocation10] ss:$0 sm:$0xff] }
 0x4e0   : > { %v1969_v19 = vpop.f32.mrf.mxu1 }
 0x54d   : > { %v2806_v20 = vpop.f32.mrf.mxu0 }
 0x54e   : > { %v1105_v60 = vadd.f32 %v2804_v15, %v2806_v20 }
 0x54f   : > { %v1962_v21 = vpop.f32.mrf.mxu0 }
 0x551   : > { %v1061_v23 = vpop.f32.mrf.mxu0 }
 0x553   : > { %v1963_v24 = vpop.f32.mrf.mxu0 }
 0x555   : > { %v1154_v25 = vpop.f32.mrf.mxu0 }
 0x556   : > { %v1160_v26 = vsel %vm796_vm2, %v1154_v25, -inf }
 0x557   : > { %1161 = vmax.xlane.f32.xlu0 %v1160_v26  ;;  %v1974_v27 = vpop.f32.mrf.mxu0 }
 0x559   : > { %v1157_v28 = vpop.f32.mrf.mxu0 }
 0x55b   : > { %v1975_v29 = vpop.f32.mrf.mxu0 }
 0x56d   : > { %1172 = vrot.lane.b32.xlu0 %v2753_v16, %s2486_s27  ;;  %s1667_s27 = sshll.u32 %s639_s21, 4  ;;  %s1668_s27 = int_to_ptr.vmem [resolvable:$true] %s1667_s27 }
 0x56e   : > { %s2377_s15 = scalar_lea.vmem %s1668_s27, 128  ;;  %p2384_p4 = scmp.lt.s32.totalorder %s1668_s27, %s2382_s19 }
 0x56f   : > { %p2378_p0 = scmp.ne.s32.totalorder %s1668_s27, %s2377_s15  ;;  %p2385_p11 = scmp.lt.s32.totalorder %s2383_s24, %s2377_s15 }
 0x571   : > { %1270 = vrot.lane.b32.xlu0 %v2753_v16, %s2487_s25  ;;  %p2379_p8 = pnand %p2378_p0, %p2975_p6  ;;  %p2386_p9 = por %p2385_p11, %p2384_p4 }
 0x573   : > { %p2380_p7 = pneg %p2379_p8 }
 0x575   : > { %1268 = vrot.lane.b32.xlu0 %v2758_v22, %s2487_s25  ;;  %p2387_p12 = pnand %p2386_p9, %p2380_p7 }
 0x5e0   : > { %v1162_v30 = vpop.xlane.xlu0 %1161 }
 0x5e1   : > { %v1163_v31 = vsub.f32 %v1154_v25, %v1162_v30 }
 0x5e3   : > { %v1164_v32 = vmul.f32 1.442695, %v1163_v31 }
 0x5e4   : > { %v1173_v33 = vpop.permute.xlu0 %1172 }
 0x5e5   : > { %2181 = vpow2.f32 %v1164_v32  ;;  %v1178_v34 = vsel %vm861_vm3, %v1173_v33, 0  ;;  %v2167_v32 = vld [vmem:[%s2933_s10 + $0x8] sm:$0xff]  }
 0x5e6   : > { %1977 = vmatpush3.bf16.msra.mxu1 %v1178_v34 }
 0x5e7   : > { %1988 = vmatprep.subr.bf16.mxu1 %v2480_v0 }
 0x5e8   : > { %v1271_v40 = vpop.permute.xlu0 %1270 }
 0x5e9   : > { %v1276_v41 = vsel %vm796_vm2, %v1271_v40, 0 }
 0x5ec   : > { %v1269_v42 = vpop.permute.xlu0 %1268 }
 0x5f2   : > { %v2182_v35 = vpop.eup %2181 }
 0x5f3   : > { %v1166_v36 = vsel %vm796_vm2, %v2182_v35, 0.0 }
 0x5f4   : > { %1167 = vadd.xlane.f32.xlu1 %v1166_v36 }
 0x67d   : > { %v1168_v37 = vpop.xlane.xlu1 %1167 }
 0x67e   : > { %2183 = vrcp.f32 %v1168_v37  ;;  %v1862_v37 = vld [vmem:[#allocation11] ss:$0 sm:$0xff] }
 0x68b   : > { %v2184_v38 = vpop.eup %2183 }
 0x68c   : > { %v1170_v39 = vmul.f32 %v2184_v38, %v2182_v35 }
 0x68e   : > { %v1171_v22 = vpack.c.bf16 %v1170_v39, %v1170_v39  ;;  %v1863_v39 = vld [vmem:[#allocation13] ss:$0 sm:$0xff] }
 0x690   : > { %1979 = vmatmul.mubr.msk.bf16.vlgmr.msra.gmra.mxu1 %vm796_vm2, %v1171_v22 }
 0x691   : > { %1989 = vmatpush3.bf16.xpose.msra.mxu1 %v1276_v41  ;;  %1990 = vmatprep.mubr.msk.bf16.mxu1 %vm2481_vm0, %v2480_v0 }
 0x692   : > { %2000 = vmatprep.subr.bf16.mxu1 %v2480_v0 }
 0x698   : > { %1991 = vmatmul.mubr.msk.bf16.vlgmr.msra.gmra.mxu1 %vm796_vm2, %v1269_v42  ;;  %v2169_v42 = vld [vmem:[%s2935_s12 + $0x18] sm:$0xff]  }
 0x699   : > { %2002 = vmatprep.mubr.msk.bf16.mxu1 %vm2481_vm0, %v2480_v0  ;;  %2001 = vmatpush3.bf16.msra.mxu1 %v1383_v1 }
 0x69a   : > { %2014 = vmatprep.subr.bf16.mxu1 %v2480_v0 }
 0x750   : > { %v1214_v45 = vpop.f32.mrf.mxu1 }
 0x751   : > { %v1220_v46 = vpack.c.bf16 %v1214_v45, %v1214_v45  ;;  %v2172_v45 = vld [vmem:[%s2935_s12] sm:$0xff]  }
 0x752   : > { %v1980_v47 = vpop.f32.mrf.mxu1 }
 0x753   : > { %1985 = vmatmul.mubr.msk.bf16.vlgmr.msra.gmra.mxu0 %vm796_vm2, %v1220_v46  ;;  %v1864_v46 = vld [vmem:[%s2934_s11] ss:$0 sm:$0xff] }
 0x754   : > { %v1217_v48 = vpop.f32.mrf.mxu1  ;;  %1996 = vmatprep.mubr.msk.bf16.mxu0 %vm2481_vm0, %v2480_v0 }
 0x756   : > { %v1981_v49 = vpop.f32.mrf.mxu1 }
 0x758   : > { %v1312_v50 = vpop.f32.mrf.mxu1 }
 0x759   : > { %v1318_v51 = vsel %vm796_vm2, %v1312_v50, -inf }
 0x75a   : > { %1319 = vmax.xlane.f32.xlu0 %v1318_v51  ;;  %v1992_v52 = vpop.f32.mrf.mxu1 }
 0x75c   : > { %v1315_v53 = vpop.f32.mrf.mxu1 }
 0x75e   : > { %v1993_v54 = vpop.f32.mrf.mxu1 }
 0x7e3   : > { %v1320_v55 = vpop.xlane.xlu0 %1319 }
 0x7e4   : > { %v1321_v56 = vsub.f32 %v1312_v50, %v1320_v55 }
 0x7e6   : > { %v1322_v57 = vmul.f32 1.442695, %v1321_v56 }
 0x7e8   : > { %2185 = vpow2.f32 %v1322_v57  ;;  %v1868_v57 = vld [vmem:[%s2936_s13] ss:$0 sm:$0xff] }
 0x7f5   : > { %v2186_v58 = vpop.eup %2185 }
 0x7f6   : > { %v1324_v59 = vsel %vm796_vm2, %v2186_v58, 0.0 }
 0x7f7   : > { %1325 = vadd.xlane.f32.xlu1 %v1324_v59 }
 0x808   : > { %1330 = vrot.lane.b32.xlu1 %v2753_v16, %s2488_s23 }
 0x813   : > { %v1261_v61 = vpop.f32.mrf.mxu0 }
 0x814   : > { %v1267_v63 = vadd.f32 %v1261_v61, %v1105_v60 }
 0x815   : > { %v1986_v2 = vpop.f32.mrf.mxu0 }
 0x817   : > { %v1264_v3 = vpop.f32.mrf.mxu0 }
 0x819   : > { %v1987_v4 = vpop.f32.mrf.mxu0 }
 0x880   : > { %v1326_v5 = vpop.xlane.xlu1 %1325 }
 0x881   : > { %2187 = vrcp.f32 %v1326_v5 }
 0x884   : > { %v1331_v7 = vpop.permute.xlu1 %1330 }
 0x885   : > { %v1336_v8 = vsel %vm861_vm3, %v1331_v7, 0 }
 0x886   : > { %1995 = vmatpush3.bf16.msra.mxu0 %v1336_v8 }
 0x887   : > { %2006 = vmatprep.subr.bf16.mxu0 %v2480_v0 }
 0x88e   : > { %v2188_v16 = vpop.eup %2187 }
 0x88f   : > { %v1328_v9 = vmul.f32 %v2188_v16, %v2186_v58 }
 0x891   : > { %v1329_v10 = vpack.c.bf16 %v1328_v9, %v1328_v9 }
 0x893   : > { %1997 = vmatmul.mubr.msk.bf16.vlgmr.msra.gmra.mxu0 %vm796_vm2, %v1329_v10 }
 0x894   : > { %2010 = vmatprep.mubr.msk.bf16.mxu0 %vm2481_vm0, %v2480_v0  ;;  %2007 = vmatpush3.bf16.msra.mxu0 %v2167_v32 }
 0x895   : > { %2008 = vmatprep.subr.bf16.mxu0 %v2480_v0 }
 0x953   : > { %v1372_v11 = vpop.f32.mrf.mxu0 }
 0x954   : > { %v1378_v12 = vpack.c.bf16 %v1372_v11, %v1372_v11  ;;  %v1874_v11 = vld [vmem:[%s2937_s14] ss:$0 sm:$0xff] }
 0x955   : > { %v1998_v13 = vpop.f32.mrf.mxu0 }
 0x956   : > { %2003 = vmatmul.mubr.msk.bf16.vlgmr.msra.gmra.mxu1 %vm796_vm2, %v1378_v12  ;;  %v1875_v13 = vld [vmem:[%s2973_s29] ss:$0 sm:$0xff] }
 0x957   : > { %v1375_v14 = vpop.f32.mrf.mxu0  ;;  %2022 = vmatprep.mubr.msk.bf16.mxu1 %vm2481_vm0, %v2480_v0  ;;  %2015 = vmatpush3.bf16.msra.mxu1 %v2169_v42 }
 0x958   : > { %2016 = vmatprep.subr.bf16.mxu1 %v2480_v0 }
 0x959   : > { %v1999_v15 = vpop.f32.mrf.mxu0 }
 0x95b   : > { %2017 = vmatpush3.bf16.msra.mxu1 %v2170_v43 }
 0x95c   : > { %2018 = vmatprep.subr.bf16.mxu1 %v2480_v0 }
 0x95f   : > { %2019 = vmatpush3.bf16.msra.mxu1 %v2171_v44 }
 0x960   : > { %2020 = vmatprep.subr.bf16.mxu1 %v2480_v0 }
 0x963   : > { %2021 = vmatpush3.bf16.msra.mxu1 %v2172_v45 }
 0xa16   : > { %v1419_v17 = vpop.f32.mrf.mxu1 }
 0xa17   : > { %v1425_v19 = vadd.f32 %v1419_v17, %v1267_v63 }
 0xa18   : > { %v2004_v20 = vpop.f32.mrf.mxu1 }
 0xa19   : > { %v1433_v21 = vadd.f32 %v1861_v18, %v1425_v19 }
 0xa1a   : > { %v1422_v23 = vpop.f32.mrf.mxu1 }
 0xa1b   : > { %v1434_v24 = vadd.f32 %v1433_v21, %v2741_v6  ;;  %v2168_v6 = vld [vmem:[%s2933_s10] sm:$0xff]  }
 0xa1c   : > { %v2005_v25 = vpop.f32.mrf.mxu1  ;;  %2009 = vmatpush3.bf16.msra.mxu0 %v2168_v6 }
 0xa1d   : > { %v1437_v26 = vsel %vm679_vm1, %v1434_v24, 0.0 }
 0xa1e   : > { %1438 = vadd.xlane.f32.xlu1 %v1437_v26 }
 0xaa7   : > { %v1439_v27 = vpop.xlane.xlu1 %1438 }
 0xaa8   : > { %v1441_v28 = vmul.f32 0.03125, %v1439_v27 }
 0xaaa   : > { %v1442_v29 = vsub.f32 %v1434_v24, %v1441_v28 }
 0xaac   : > { %v1443_v30 = vmul.f32 %v1442_v29, %v1442_v29 }
 0xaae   : > { %v1444_v31 = vsel %vm679_vm1, %v1443_v30, 0.0 }
 0xaaf   : > { %1445 = vadd.xlane.f32.xlu0 %v1444_v31 }
 0xb38   : > { %v1446_v33 = vpop.xlane.xlu0 %1445 }
 0xb39   : > { %v1447_v34 = vmul.f32 0.03125, %v1446_v33 }
 0xb3b   : > { %v1448_v35 = vadd.f32 1e-05, %v1447_v34 }
 0xb3d   : > { %2189 = vrsqrt.f32 %v1448_v35 }
 0xb4a   : > { %v2190_v36 = vpop.eup %2189 }
 0xb4b   : > { %v1450_v38 = vmul.f32 %v2190_v36, %v1442_v29 }
 0xb4d   : > { %v1457_v40 = vmul.f32 %v1862_v37, %v1450_v38 }
 0xb4f   : > { %v1464_v22 = vadd.f32 %v1863_v39, %v1457_v40 }
 0xb51   : > { %v1465_v41 = vpack.c.bf16 %v1464_v22, %v1464_v22 }
 0xb53   : > { %2011 = vmatmul.mubr.msk.bf16.vlgmr.msra.gmra.mxu0 %vm679_vm1, %v1465_v41 }
 0xc13   : > { %v1526_v47 = vpop.f32.mrf.mxu0 }
 0xc14   : > { %v1527_v48 = vadd.f32 %v1864_v46, %v1526_v47 }
 0xc15   : > { %v2012_v49 = vpop.f32.mrf.mxu0 }
 0xc16   : > { %v1533_v50 = vmul.f32 0.70710677, %v1527_v48  ;;  %v1532_v54 = vmul.f32 0.5, %v1527_v48 }
 0xc17   : > { %v1529_v51 = vpop.f32.mrf.mxu0 }
 0xc18   : > { %2191 = verf.f32 %v1533_v50 }
 0xc19   : > { %v2013_v52 = vpop.f32.mrf.mxu0 }
 0xc25   : > { %v2192_v53 = vpop.eup %2191 }
 0xc26   : > { %v1535_v55 = vadd.f32 1.0, %v2192_v53 }
 0xc28   : > { %v1536_v0 = vmul.f32 %v1535_v55, %v1532_v54 }
 0xc2a   : > { %v1537_v56 = vpack.c.bf16 %v1536_v0, %v1536_v0 }
 0xc2c   : > { %2023 = vmatmul.mubr.msk.bf16.vlgmr.msra.gmra.mxu1 %vm1577_vm4, %v1537_v56 }
 0xcec   : > { %v1615_v58 = vpop.f32.mrf.mxu1 }
 0xced   : > { %v1616_v59 = vadd.f32 %v1868_v57, %v1615_v58 }
 0xcee   : > { %v2024_v60 = vpop.f32.mrf.mxu1 }
 0xcef   : > { %v1621_v61 = vadd.f32 %v1616_v59, %v1464_v22 }
 0xcf0   : > { %v1618_v62 = vpop.f32.mrf.mxu1 }
 0xcf1   : > { %v1624_v63 = vsel %vm679_vm1, %v1621_v61, 0.0 }
 0xcf2   : > { %1625 = vadd.xlane.f32.xlu0 %v1624_v63  ;;  %v2025_v1 = vpop.f32.mrf.mxu1 }
 0xd7b   : > { %v1626_v2 = vpop.xlane.xlu0 %1625 }
 0xd7c   : > { %v1627_v3 = vmul.f32 0.03125, %v1626_v2 }
 0xd7e   : > { %v1628_v4 = vsub.f32 %v1621_v61, %v1627_v3 }
 0xd80   : > { %v1629_v5 = vmul.f32 %v1628_v4, %v1628_v4 }
 0xd82   : > { %v1630_v7 = vsel %vm679_vm1, %v1629_v5, 0.0 }
 0xd83   : > { %1631 = vadd.xlane.f32.xlu0 %v1630_v7 }
 0xe0c   : > { %v1632_v8 = vpop.xlane.xlu0 %1631 }
 0xe0d   : > { %v1633_v16 = vmul.f32 0.03125, %v1632_v8 }
 0xe0f   : > { %v1634_v9 = vadd.f32 1e-05, %v1633_v16 }
 0xe11   : > { %2193 = vrsqrt.f32 %v1634_v9 }
 0xe1e   : > { %v2194_v10 = vpop.eup %2193 }
 0xe1f   : > { %v1636_v12 = vmul.f32 %v2194_v10, %v1628_v4 }
 0xe21   : > { %v1643_v14 = vmul.f32 %v1874_v11, %v1636_v12 }
 0xe23   : > { %v1650_v15 = vadd.f32 %v1875_v13, %v1643_v14 }
 0xe25   : > { %1651 = vst.msk [vmem:[%s639_s21] sm:$0xff] %vm679_vm1, %v1650_v15 }
 0xe26   : > { %2390 = shalt.err (!%p2387_p12)
}
 0xe27   : > { %s2391_s16 = scalar_lea.hbm %s1665_s26, 128  ;;  %s2395_s29 = scalar_lea.hbm %s2974_s17, 256 }
 0xe28   : > { %p2392_p1 = scmp.ne.s32.totalorder %s1665_s26, %s2391_s16  ;;  %p2396_p3 = scmp.lt.s32.totalorder %s1665_s26, %s2974_s17 }
 0xe29   : > { %p2397_p10 = scmp.lt.s32.totalorder %s2395_s29, %s2391_s16 }
 0xe2a   : > { %p2393_p2 = pnand %p2392_p1, %p2975_p6 }
 0xe2b   : > { %p2398_p13 = por %p2397_p10, %p2396_p3 }
 0xe2c   : > { %p2394_p5 = pneg %p2393_p2 }
 0xe2e   : > { %p2399_p0 = pnand %p2398_p13, %p2394_p5 }
 0xe30   : > { %2402 = shalt.err (!%p2399_p0)
}
 0xe31   : > { %2054 = dma.vmem_to_hbm [thread:$0]  (%p2975_p6), %s1668_s27, 128, %s1665_s26, %s1653_s1  }
 0xe32 PF: > { %s2976_s25 = sld [smem:[#allocation23_spill]] }
 0xe33   : > { %s2977_s23 = sld [smem:[#allocation20_spill]] }
 0xe34   : > { %s2978_s15 = sld [smem:[#allocation25_spill]] }
 0xe38   : > { %p2096_p8 = scmp.ge.s32.totalorder %s2976_s25, 2 }
 0xe39   : > { %s1679_s28 = sand.u32 1, %s2977_s23  }
 0xe3a   : > { %p2979_p7 = scmp.ne.s32.totalorder %s2978_s15, 0  ;;  %s1680_s19 = scalar_lea.sflag [#allocation4], %s1679_s28 }
 0xe3c   : > { %p2079_p4 = pnand %p2096_p8, %p2979_p7 }
 0xe3e   : > { %p2080_p11 = pneg %p2079_p4 }
 0xe40   : > { %2444 = dma.done.wait (%p2080_p11), %s1680_s19, 128  }
 0xe41   : > { %2446 = vsyncadd (%p2080_p11), %s1680_s19, 4294967168  ;;  %s33_s26 = sadd.s32 1, %s2976_s25   ;;  %s2980_s24 = sld [smem:[#allocation21_spill]] }
 0xe42   : > { %p30_p9 = scmp.ge.s32.totalorder %s33_s26, 4   ;;  %s2981_s23 = sld [smem:[#allocation26_spill]] }
 0xe43   : > { %s2982_s0 = sld [smem:[#allocation22_spill]]  ;;  %s2984_s21 = smov %s2453_s22 }
 0xe44   : > { %s2983_s25 = sld [smem:[#allocation24_spill]] }
 0xe45   :  { %32 = sbr.rel (!%p30_p9) target bundleno = 13 (0xd), region = 151 }
 0xe47   : > { %s2985_s22 = smov %s2980_s24 }
 0xe49   : > { %s2986_s24 = smov %s2982_s0 }
 0xe4a   :  { %1685 = vsyncpa [#allocation3], 1 }
 0xe4b   :  { %1687 = vsyncpa [#allocation3 + $0x1], 1 }
 0xe4c   :  { %1688 = vsyncpa [#allocation6], 1 }
 0xe4d   :  { %1689 = vsyncpa [#allocation9], 1 }
 0xe4e   :  { %1690 = vsyncpa [#allocation12], 1 }
 0xe4f   :  { %1691 = vsyncpa [#allocation4], 1 }
 0xe50   :  { %1693 = vsyncpa [#allocation4 + $0x1], 1 }

</bundles_post_ra>
